<compile_context>
chip_gen: v7x
topology: tpu7x:2x2x1
jax: 0.10.0
libtpu: 0.0.40
codegen_flags: <defaults>
</compile_context>

<pallas_src>
import functools

import jax
import jax.numpy as jnp
from jax.experimental import pallas as pl
from jax.experimental.pallas import tpu as pltpu

NEG_SLOPE = 0.2           # LeakyReLU(negative_slope=0.2)
DROP_P = 0.3              # nn.Dropout(0.3)
_VMEM_BUDGET = 40 * 1024 * 1024   # conservative across v5e / v6e / v7x


def _leaky_relu(h):
    return jnp.where(h >= 0, h, NEG_SLOPE * h)


def _dropout(h, keep_p):
    # Inverted dropout via the TPU hardware PRNG (training mode only).
    # Raw 24-bit PRNG values compared against an integer threshold: no
    # int->float convert / multiply per element.
    bits = pltpu.prng_random_bits(h.shape)
    bits24 = jax.lax.bitwise_and(
        bits, jnp.array(0xFFFFFF, dtype=bits.dtype)).astype(jnp.int32)
    keep = bits24 < jnp.int32(int(keep_p * (1 << 24)))
    return jnp.where(keep, h * (1.0 / keep_p), jnp.zeros_like(h))


def disc_kernel(seed_ref,                        # scalar-prefetch (SMEM)
                x_ref,                           # (tile, in_features) input dtype
                w1, b1, w2, b2, w3, b3, w4, b4,  # w1..w3 bf16, biases f32
                o_ref,                           # (tile, out_features) f32
                *, training, single_logit):
    if training:
        # Distinct PRNG stream per batch tile; streams of different calls are
        # spaced by num_programs so they don't collide across seeds.
        pltpu.prng_seed(seed_ref[0] * pl.num_programs(0) + pl.program_id(0))

    def hidden_layer(h_bf16, w_ref, b_ref):
        # bf16 x bf16 matmul on the MXU with f32 accumulation.
        h = jnp.dot(h_bf16, w_ref[...], preferred_element_type=jnp.float32)
        h = h + b_ref[...]                       # f32 bias add
        h = _leaky_relu(h)                       # f32 elementwise (v5e-safe)
        if training:
            h = _dropout(h, 1.0 - DROP_P)
        return h

    # In-kernel cast: x is streamed from HBM in its original dtype (f32) and
    # packed to bf16 on the VPU right before the first dot.
    x = x_ref[...].astype(jnp.bfloat16)
    h = hidden_layer(x, w1, b1).astype(jnp.bfloat16)
    h = hidden_layer(h, w2, b2).astype(jnp.bfloat16)
    h = hidden_layer(h, w3, b3)                  # stays f32 for the final layer

    if single_logit:
        # fc4 (K=32, N=1): VPU broadcast-multiply + XLU row reduction instead
        # of a tiny MXU launch; w4 arrives pre-transposed as (1, 32) f32.
        logit = jnp.sum(h * w4[...], axis=-1, keepdims=True) + b4[...]
    else:
        logit = jnp.dot(h.astype(jnp.bfloat16), w4[...],
                        preferred_element_type=jnp.float32) + b4[...]
    o_ref[...] = logit.astype(o_ref.dtype)


def _round_up(n, m):
    return ((n + m - 1) // m) * m


def _vmem_bytes(tile, in_features, x_itemsize, n_x_buffers):
    """Rough VMEM footprint estimate for tile selection."""
    x_b = n_x_buffers * tile * in_features * x_itemsize
    acts = tile * (128 + 64 + 32) * (4 + 2)            # f32 + bf16 activations
    w_b = 2 * 2 * (in_features * 128 + 128 * 64 + 64 * 32 + 32 * 128)
    out_b = 2 * tile * 128 * 4
    return x_b + acts + w_b + out_b


def discriminator_forward(x, params, *, training=False, seed=0, batch_tile=1024):
    """x: (B, C, H, W) or (B, in_features). Returns f32 logits (B, out_features)."""
    B = x.shape[0]
    xf = x.reshape(B, -1)                        # x.view(batch_size, -1)
    in_features = xf.shape[1]
    x_itemsize = jnp.dtype(xf.dtype).itemsize

    w1, b1, w2, b2, w3, b3, w4, b4 = params
    out_features = w4.shape[1]
    single_logit = (out_features == 1)

    w1, w2, w3 = (w.astype(jnp.bfloat16) for w in (w1, w2, w3))
    b1, b2, b3, b4 = (b.reshape(1, -1).astype(jnp.float32)
                      for b in (b1, b2, b3, b4))
    if single_logit:
        w4k = w4.astype(jnp.float32).T           # (1, 32): VPU path in-kernel
    else:
        w4k = w4.astype(jnp.bfloat16)

    # ---- batch tiling ------------------------------------------------------
    # At least 2 blocks when there are enough rows so v7x's two TensorCores
    # both participate; otherwise the largest tile that fits the VMEM budget.
    min_blocks = 2 if B >= 32 else 1
    nblk = max(pl.cdiv(B, batch_tile), min_blocks)
    tile = max(16, _round_up(pl.cdiv(B, nblk), 16))
    while tile > 16 and _vmem_bytes(tile, in_features, x_itemsize, 3) > _VMEM_BUDGET:
        tile = max(16, _round_up(tile // 2, 16))

    if B < tile:
        # Tiny batch: pad to one full block (cheap) so the block never exceeds
        # the array extent.
        xf = jnp.pad(xf, ((0, tile - B), (0, 0)))
        rows = tile
    else:
        # No pad pass over x: Pallas handles the ragged last block (padded
        # reads only affect rows we slice off; OOB writes are dropped).
        rows = B
    num_tiles = pl.cdiv(rows, tile)

    def xmap(i, seed):   # noqa: ARG001  scalar-prefetch ref is positional
        return (i, 0)

    def rep(i, seed):    # noqa: ARG001  weights/biases: same block every step
        return (0, 0)

    x_spec_kwargs = {}
    if num_tiles >= 3:
        # Deeper input buffering keeps the HBM pipe full on long batches.
        x_spec_kwargs["pipeline_mode"] = pl.Buffered(3)

    kernel = functools.partial(disc_kernel, training=training,
                               single_logit=single_logit)

    # Advisory cost estimate so XLA schedules the call well.
    flops = 2 * rows * (in_features * 128 + 128 * 64 + 64 * 32
                        + 32 * out_features)
    bytes_accessed = int(
        rows * in_features * x_itemsize
        + rows * out_features * 4
        + sum(int(p.size) * p.dtype.itemsize
              for p in (w1, b1, w2, b2, w3, b3, w4k, b4)))
    cost = pl.CostEstimate(flops=flops, transcendentals=0,
                           bytes_accessed=bytes_accessed)

    vmem_need = _vmem_bytes(tile, in_features, x_itemsize,
                            3 if num_tiles >= 3 else 2)
    # Raise the scoped-VMEM limit only when the default (16 MiB on v5e) would
    # be tight; 48 MiB is safe on every generation (v7x physical = 64 MiB).
    vmem_limit = 48 * 1024 * 1024 if vmem_need > 14 * 1024 * 1024 else None

    out = pl.pallas_call(
        kernel,
        out_shape=jax.ShapeDtypeStruct((rows, out_features), jnp.float32),
        grid_spec=pltpu.PrefetchScalarGridSpec(
            num_scalar_prefetch=1,
            grid=(num_tiles,),
            in_specs=[
                pl.BlockSpec((tile, in_features), xmap, **x_spec_kwargs),
                pl.BlockSpec(w1.shape, rep), pl.BlockSpec(b1.shape, rep),
                pl.BlockSpec(w2.shape, rep), pl.BlockSpec(b2.shape, rep),
                pl.BlockSpec(w3.shape, rep), pl.BlockSpec(b3.shape, rep),
                pl.BlockSpec(w4k.shape, rep), pl.BlockSpec(b4.shape, rep),
            ],
            out_specs=pl.BlockSpec((tile, out_features), xmap),
        ),
        compiler_params=pltpu.CompilerParams(
            dimension_semantics=("parallel",),   # batch blocks are independent
            vmem_limit_bytes=vmem_limit),
        cost_estimate=cost,
    )(jnp.array([seed], dtype=jnp.int32), xf,
      w1, b1, w2, b2, w3, b3, w4k, b4)

    return out[:B]


def init_linear(key, fan_in, fan_out):
    """Deterministic init mimicking nn.Linear defaults: U(-1/sqrt(fan_in), +)."""
    kw, kb = jax.random.split(key)
    bound = 1.0 / float(fan_in) ** 0.5
    w = jax.random.uniform(kw, (fan_in, fan_out), jnp.float32, -bound, bound)
    b = jax.random.uniform(kb, (1, fan_out), jnp.float32, -bound, bound)
    return w, b


def init_discriminator_params(key, in_features, out_features):
    k1, k2, k3, k4 = jax.random.split(key, 4)
    w1, b1 = init_linear(k1, in_features, 128)
    w2, b2 = init_linear(k2, 128, 64)
    w3, b3 = init_linear(k3, 64, 32)
    w4, b4 = init_linear(k4, 32, out_features)
    return (w1, b1, w2, b2, w3, b3, w4, b4)


def reference_forward(x, params):
    """Pure-JAX reference (eval mode: dropout = identity), mirroring the
    kernel's bf16 quantization with f32 accumulation so the check isolates the
    Pallas plumbing rather than bf16 rounding."""
    w1, b1, w2, b2, w3, b3, w4, b4 = params
    q = lambda a: a.astype(jnp.bfloat16).astype(jnp.float32)
    h = q(x.reshape(x.shape[0], -1))
    h = q(_leaky_relu(h @ q(w1) + b1))
    h = q(_leaky_relu(h @ q(w2) + b2))
    h = _leaky_relu(h @ q(w3) + b3)              # stays f32, like the kernel
    if w4.shape[1] == 1:
        return h @ w4 + b4                       # f32 VPU path
    return q(h) @ q(w4) + b4


if __name__ == "__main__":
    key = jax.random.PRNGKey(0)
    kx, kp = jax.random.split(key)

    # Input consistent with flattening an NCHW image batch: (2, 4, 16, 16)
    B, C, H, W = 2, 4, 16, 16
    in_features = C * H * W          # 1024
    out_features = 1                 # real/fake logit

    x = jax.random.normal(kx, (B, C, H, W), dtype=jnp.float32)
    params = init_discriminator_params(kp, in_features, out_features)

    # Eval-mode (deterministic) forward: dropout is identity, matching
    # PyTorch .eval() semantics.
    logits = jax.block_until_ready(
        discriminator_forward(x, params, training=False))

    ref = reference_forward(x, params)
    assert logits.shape == (B, out_features)
    assert jnp.allclose(logits, ref, atol=2e-3, rtol=2e-3), (
        float(jnp.max(jnp.abs(logits - ref))))

    # TODO(synk): training-mode dropout uses the TPU hardware PRNG
    # (pltpu.prng_seed / prng_random_bits), which has no CPU/interpret-mode
    # lowering and cannot reproduce torch's RNG stream bit-for-bit, so it is
    # implemented (training=True) but not exercised here.

    print("KERNEL_OK")
</pallas_src>

<mosaic_0001>
module attributes {stable_mosaic.version = 11 : i64} {
  func.func @disc_kernel(%arg0: i32, %arg1: memref<1xi32, #tpu.memory_space<smem>>, %arg2: memref<16x1024xf32, #tpu.memory_space<vmem>>, %arg3: memref<1024x128xbf16, #tpu.memory_space<vmem>>, %arg4: memref<1x128xf32, #tpu.memory_space<vmem>>, %arg5: memref<128x64xbf16, #tpu.memory_space<vmem>>, %arg6: memref<1x64xf32, #tpu.memory_space<vmem>>, %arg7: memref<64x32xbf16, #tpu.memory_space<vmem>>, %arg8: memref<1x32xf32, #tpu.memory_space<vmem>>, %arg9: memref<1x32xf32, #tpu.memory_space<vmem>>, %arg10: memref<1x1xf32, #tpu.memory_space<vmem>>, %arg11: memref<16x1xf32, #tpu.memory_space<vmem>>) attributes {dimension_semantics = [#tpu.dimension_semantics<parallel>], iteration_bounds = array<i64: 1>, scalar_prefetch = 1 : i64, scratch_operands = 0 : i64, tpu.core_type = #tpu.core_type<tc>, window_params = [{transform_indices = @transform_0, window_bounds = array<i64: 16, 1024>}, {pipeline_mode = #tpu.pipeline_mode<synchronous>, transform_indices = @transform_1, window_bounds = array<i64: 1024, 128>}, {pipeline_mode = #tpu.pipeline_mode<synchronous>, transform_indices = @transform_2, window_bounds = array<i64: 1, 128>}, {pipeline_mode = #tpu.pipeline_mode<synchronous>, transform_indices = @transform_3, window_bounds = array<i64: 128, 64>}, {pipeline_mode = #tpu.pipeline_mode<synchronous>, transform_indices = @transform_4, window_bounds = array<i64: 1, 64>}, {pipeline_mode = #tpu.pipeline_mode<synchronous>, transform_indices = @transform_5, window_bounds = array<i64: 64, 32>}, {pipeline_mode = #tpu.pipeline_mode<synchronous>, transform_indices = @transform_6, window_bounds = array<i64: 1, 32>}, {pipeline_mode = #tpu.pipeline_mode<synchronous>, transform_indices = @transform_7, window_bounds = array<i64: 1, 32>}, {pipeline_mode = #tpu.pipeline_mode<synchronous>, transform_indices = @transform_8, window_bounds = array<i64: 1, 1>}, {transform_indices = @transform_9, window_bounds = array<i64: 16, 1>}]} {
    %c0 = arith.constant 0 : index
    %c0_0 = arith.constant 0 : index
    %0 = vector.load %arg2[%c0, %c0_0] : memref<16x1024xf32, #tpu.memory_space<vmem>>, vector<16x1024xf32>
    %1 = arith.truncf %0 : vector<16x1024xf32> to vector<16x1024xbf16>
    %c0_1 = arith.constant 0 : index
    %c0_2 = arith.constant 0 : index
    %2 = vector.load %arg3[%c0_1, %c0_2] : memref<1024x128xbf16, #tpu.memory_space<vmem>>, vector<1024x128xbf16>
    %cst = arith.constant dense<0.000000e+00> : vector<16x128xf32>
    %3 = tpu.matmul %1, %2, %cst {dimension_numbers = #tpu.dot_dimension_numbers<[1], [0], [0], [1], [0, 0, 1, 1], [], []>} : vector<16x1024xbf16>, vector<1024x128xbf16>, vector<16x128xf32> -> vector<16x128xf32>
    %c0_3 = arith.constant 0 : index
    %c0_4 = arith.constant 0 : index
    %4 = vector.load %arg4[%c0_3, %c0_4] : memref<1x128xf32, #tpu.memory_space<vmem>>, vector<1x128xf32>
    %5 = vector.broadcast %4 : vector<1x128xf32> to vector<16x128xf32>
    %6 = arith.addf %3, %5 : vector<16x128xf32>
    %cst_5 = arith.constant 0.000000e+00 : f32
    %7 = vector.broadcast %cst_5 : f32 to vector<16x128xf32>
    %8 = arith.cmpf oge, %6, %7 : vector<16x128xf32>
    %cst_6 = arith.constant 2.000000e-01 : f32
    %9 = vector.broadcast %cst_6 : f32 to vector<16x128xf32>
    %10 = arith.mulf %9, %6 : vector<16x128xf32>
    %11 = arith.select %8, %6, %10 : vector<16x128xi1>, vector<16x128xf32>
    %12 = arith.truncf %11 : vector<16x128xf32> to vector<16x128xbf16>
    %c0_7 = arith.constant 0 : index
    %c0_8 = arith.constant 0 : index
    %13 = vector.load %arg5[%c0_7, %c0_8] : memref<128x64xbf16, #tpu.memory_space<vmem>>, vector<128x64xbf16>
    %cst_9 = arith.constant dense<0.000000e+00> : vector<16x64xf32>
    %14 = tpu.matmul %12, %13, %cst_9 {dimension_numbers = #tpu.dot_dimension_numbers<[1], [0], [0], [1], [0, 0, 1, 1], [], []>} : vector<16x128xbf16>, vector<128x64xbf16>, vector<16x64xf32> -> vector<16x64xf32>
    %c0_10 = arith.constant 0 : index
    %c0_11 = arith.constant 0 : index
    %15 = vector.load %arg6[%c0_10, %c0_11] : memref<1x64xf32, #tpu.memory_space<vmem>>, vector<1x64xf32>
    %16 = vector.broadcast %15 : vector<1x64xf32> to vector<16x64xf32>
    %17 = arith.addf %14, %16 : vector<16x64xf32>
    %cst_12 = arith.constant 0.000000e+00 : f32
    %18 = vector.broadcast %cst_12 : f32 to vector<16x64xf32>
    %19 = arith.cmpf oge, %17, %18 : vector<16x64xf32>
    %cst_13 = arith.constant 2.000000e-01 : f32
    %20 = vector.broadcast %cst_13 : f32 to vector<16x64xf32>
    %21 = arith.mulf %20, %17 : vector<16x64xf32>
    %22 = arith.select %19, %17, %21 : vector<16x64xi1>, vector<16x64xf32>
    %23 = arith.truncf %22 : vector<16x64xf32> to vector<16x64xbf16>
    %c0_14 = arith.constant 0 : index
    %c0_15 = arith.constant 0 : index
    %24 = vector.load %arg7[%c0_14, %c0_15] : memref<64x32xbf16, #tpu.memory_space<vmem>>, vector<64x32xbf16>
    %cst_16 = arith.constant dense<0.000000e+00> : vector<16x32xf32>
    %25 = tpu.matmul %23, %24, %cst_16 {dimension_numbers = #tpu.dot_dimension_numbers<[1], [0], [0], [1], [0, 0, 1, 1], [], []>} : vector<16x64xbf16>, vector<64x32xbf16>, vector<16x32xf32> -> vector<16x32xf32>
    %c0_17 = arith.constant 0 : index
    %c0_18 = arith.constant 0 : index
    %26 = vector.load %arg8[%c0_17, %c0_18] : memref<1x32xf32, #tpu.memory_space<vmem>>, vector<1x32xf32>
    %27 = vector.broadcast %26 : vector<1x32xf32> to vector<16x32xf32>
    %28 = arith.addf %25, %27 : vector<16x32xf32>
    %cst_19 = arith.constant 0.000000e+00 : f32
    %29 = vector.broadcast %cst_19 : f32 to vector<16x32xf32>
    %30 = arith.cmpf oge, %28, %29 : vector<16x32xf32>
    %cst_20 = arith.constant 2.000000e-01 : f32
    %31 = vector.broadcast %cst_20 : f32 to vector<16x32xf32>
    %32 = arith.mulf %31, %28 : vector<16x32xf32>
    %33 = arith.select %30, %28, %32 : vector<16x32xi1>, vector<16x32xf32>
    %c0_21 = arith.constant 0 : index
    %c0_22 = arith.constant 0 : index
    %34 = vector.load %arg9[%c0_21, %c0_22] : memref<1x32xf32, #tpu.memory_space<vmem>>, vector<1x32xf32>
    %35 = vector.broadcast %34 : vector<1x32xf32> to vector<16x32xf32>
    %36 = arith.mulf %33, %35 : vector<16x32xf32>
    %cst_23 = arith.constant dense<0.000000e+00> : vector<16xf32>
    %37 = vector.multi_reduction <add>, %36, %cst_23 [1] : vector<16x32xf32> to vector<16xf32>
    %38 = vector.shape_cast %37 : vector<16xf32> to vector<16x1xf32>
    %c0_24 = arith.constant 0 : index
    %c0_25 = arith.constant 0 : index
    %39 = vector.load %arg10[%c0_24, %c0_25] : memref<1x1xf32, #tpu.memory_space<vmem>>, vector<1x1xf32>
    %40 = vector.broadcast %39 : vector<1x1xf32> to vector<16x1xf32>
    %41 = arith.addf %38, %40 : vector<16x1xf32>
    %c0_26 = arith.constant 0 : index
    %c0_27 = arith.constant 0 : index
    %42 = vector.load %arg11[%c0_26, %c0_27] : memref<16x1xf32, #tpu.memory_space<vmem>>, vector<16x1xf32>
    tpu.vector_store %arg11[%c0_26, %c0_27], %41 {strides = array<i32>} : memref<16x1xf32, #tpu.memory_space<vmem>>, vector<16x1xf32>,
    return
  }
  func.func @transform_0(%arg0: i32, %arg1: memref<1xi32, #tpu.memory_space<smem>>) -> (i32, i32) {
    %c0_i32 = arith.constant 0 : i32
    %c0_i32_0 = arith.constant 0 : i32
    return %arg0, %c0_i32 : i32, i32
  }
  func.func @transform_1(%arg0: i32, %arg1: memref<1xi32, #tpu.memory_space<smem>>) -> (i32, i32) {
    %c0_i32 = arith.constant 0 : i32
    %c0_i32_0 = arith.constant 0 : i32
    %c0_i32_1 = arith.constant 0 : i32
    return %c0_i32, %c0_i32_0 : i32, i32
  }
  func.func @transform_2(%arg0: i32, %arg1: memref<1xi32, #tpu.memory_space<smem>>) -> (i32, i32) {
    %c0_i32 = arith.constant 0 : i32
    %c0_i32_0 = arith.constant 0 : i32
    %c0_i32_1 = arith.constant 0 : i32
    return %c0_i32, %c0_i32_0 : i32, i32
  }
  func.func @transform_3(%arg0: i32, %arg1: memref<1xi32, #tpu.memory_space<smem>>) -> (i32, i32) {
    %c0_i32 = arith.constant 0 : i32
    %c0_i32_0 = arith.constant 0 : i32
    %c0_i32_1 = arith.constant 0 : i32
    return %c0_i32, %c0_i32_0 : i32, i32
  }
  func.func @transform_4(%arg0: i32, %arg1: memref<1xi32, #tpu.memory_space<smem>>) -> (i32, i32) {
    %c0_i32 = arith.constant 0 : i32
    %c0_i32_0 = arith.constant 0 : i32
    %c0_i32_1 = arith.constant 0 : i32
    return %c0_i32, %c0_i32_0 : i32, i32
  }
  func.func @transform_5(%arg0: i32, %arg1: memref<1xi32, #tpu.memory_space<smem>>) -> (i32, i32) {
    %c0_i32 = arith.constant 0 : i32
    %c0_i32_0 = arith.constant 0 : i32
    %c0_i32_1 = arith.constant 0 : i32
    return %c0_i32, %c0_i32_0 : i32, i32
  }
  func.func @transform_6(%arg0: i32, %arg1: memref<1xi32, #tpu.memory_space<smem>>) -> (i32, i32) {
    %c0_i32 = arith.constant 0 : i32
    %c0_i32_0 = arith.constant 0 : i32
    %c0_i32_1 = arith.constant 0 : i32
    return %c0_i32, %c0_i32_0 : i32, i32
  }
  func.func @transform_7(%arg0: i32, %arg1: memref<1xi32, #tpu.memory_space<smem>>) -> (i32, i32) {
    %c0_i32 = arith.constant 0 : i32
    %c0_i32_0 = arith.constant 0 : i32
    %c0_i32_1 = arith.constant 0 : i32
    return %c0_i32, %c0_i32_0 : i32, i32
  }
  func.func @transform_8(%arg0: i32, %arg1: memref<1xi32, #tpu.memory_space<smem>>) -> (i32, i32) {
    %c0_i32 = arith.constant 0 : i32
    %c0_i32_0 = arith.constant 0 : i32
    %c0_i32_1 = arith.constant 0 : i32
    return %c0_i32, %c0_i32_0 : i32, i32
  }
  func.func @transform_9(%arg0: i32, %arg1: memref<1xi32, #tpu.memory_space<smem>>) -> (i32, i32) {
    %c0_i32 = arith.constant 0 : i32
    %c0_i32_0 = arith.constant 0 : i32
    return %arg0, %c0_i32 : i32, i32
  }
}

</mosaic_0001>

<bundles_post_ra>
// kernel: tpu_custom_call.1
= control target key start
LH: loop header
LB: loop body
LE: loop exit
PB: predicated region body
PF: predicated region fallthrough
CT: control target
= control target key end

     0   :  { %s1519_s0 = inlined_call_operand.<no memory space> [shape: s32[1], index: 0, kind: input, shape index: {}]   ;;  %s1520_s1 = inlined_call_operand.vmem [shape: f32[16,1024], index: 1, kind: input, shape index: {}]   ;;  %s1521_s2 = inlined_call_operand.hbm [shape: bf16[1024,128], index: 2, kind: input, shape index: {}]   ;;  %s1522_s3 = inlined_call_operand.vmem [shape: f32[1,128], index: 3, kind: input, shape index: {}]   ;;  %s1523_s4 = inlined_call_operand.vmem [shape: bf16[128,64], index: 4, kind: input, shape index: {}]   ;;  %s1524_s5 = inlined_call_operand.vmem [shape: f32[1,64], index: 5, kind: input, shape index: {}]   ;;  %s1525_s6 = inlined_call_operand.vmem [shape: bf16[64,32], index: 6, kind: input, shape index: {}]   ;;  %s1526_s7 = inlined_call_operand.vmem [shape: f32[1,32], index: 7, kind: input, shape index: {}]   ;;  %s1527_s8 = inlined_call_operand.vmem [shape: f32[1,32], index: 8, kind: input, shape index: {}]   ;;  %s1528_s9 = inlined_call_operand.<no memory space> [shape: f32[1,1], index: 9, kind: input, shape index: {}]   ;;  %s1529_s10 = inlined_call_operand.vmem [shape: f32[16,1], index: 10, kind: output, shape index: {}]  }
   0x1   :  { %v16_v0 = vstv %s1528_s9 }
   0x2   :  { %17 = vst [vmem:[#allocation4] sm:$0x1] %v16_v0 }
   0x3   :  { %18 = vsyncpa [#allocation6], 0  ;;  %s1328_s14 = smov [#allocation5]   ;;  %s1304_s18 = scalar_lea.hbm %s1521_s2, 8192 }
   0x4   :  { %s26_s15 = sshll.u32 %s1328_s14, 4  ;;  %p1305_p0 = scmp.ne.s32.totalorder %s1521_s2, %s1304_s18  ;;  %s27_s15 = int_to_ptr.vmem [resolvable:$true] %s26_s15 }
   0x5   :  { %p1308_p1 = scmp.lt.u32.totalorder %s1304_s18, %s1521_s2 }
   0x7   :  { %p1310_p2 = pnand %p1308_p1, %p1305_p0 }
   0x9   :  { %1313 = shalt.err (!%p1310_p2)
}
   0xa   :  { %s1314_s9 = scalar_lea.vmem %s27_s15, 8192  ;;  %p1319_p4 = scmp.lt.s32.totalorder %s27_s15, %s27_s15 }
   0xb   :  { %p1315_p3 = scmp.ne.s32.totalorder %s27_s15, %s1314_s9  ;;  %p1320_p5 = scmp.lt.s32.totalorder %s1314_s9, %s1314_s9 }
   0xd   :  { %p1321_p6 = por %p1320_p5, %p1319_p4 }
   0xf   :  { %p1322_p7 = pnand %p1321_p6, %p1315_p3 }
  0x11   :  { %1325 = shalt.err (!%p1322_p7)
}
  0x12   :  { %s1329_s23 = smov 64   ;;  %s1330_s24 = smov 4  }
  0x13   :  { %32 = dma.hbm_to_vmem [thread:$0]  %s1521_s2, 8192, %s27_s15, [#allocation6], %s1329_s23, %s1329_s23, %s1330_s24  }
  0x14   :  { %1326 = dma.done.wait [#allocation6], 8192  }
  0x15   :  { %1327 = vsyncadd [#allocation6], 4294959104  ;;  %v1228_v1 = vld [vmem:[#allocation5 + $0x40] sm:$0xff]   ;;  %v1232_v5 = vld [vmem:[#allocation5 + $0x48] sm:$0xff]   ;;  %vm1332_vm0 = vmmov 0   ;;  %vm923_vm5 = vcmask 523264  }
  0x16   :  { %v1229_v2 = vld [vmem:[#allocation5 + $0xc0] sm:$0xff]   ;;  %1089 = vmatprep.subr.bf16.mxu0 %v1228_v1  ;;  %v1233_v6 = vld [vmem:[#allocation5 + $0xc8] sm:$0xff]   ;;  %v1236_v9 = vld [vmem:[#allocation5 + $0x50] sm:$0xff]   ;;  %vm983_vm8 = vcmask 261120   ;;  %vm999_vm9 = vcmask 7168  }
  0x17   :  { %v1230_v3 = vld [vmem:[#allocation5] sm:$0xff]   ;;  %1111 = vmatprep.subr.bf16.mxu1 %v1229_v2  ;;  %v1234_v7 = vld [vmem:[#allocation5 + $0x8] sm:$0xff]   ;;  %v1237_v10 = vld [vmem:[#allocation5 + $0xd0] sm:$0xff]  }
  0x18   :  { %v1231_v4 = vld [vmem:[#allocation5 + $0x80] sm:$0xff]   ;;  %1090 = vmatpush3.bf16.msra.mxu0 %v1230_v3  ;;  %v1235_v8 = vld [vmem:[#allocation5 + $0x88] sm:$0xff]   ;;  %v1238_v11 = vld [vmem:[#allocation5 + $0x10] sm:$0xff]  }
  0x19   :  { %1112 = vmatpush3.bf16.msra.mxu1 %v1231_v4  ;;  %1091 = vmatprep.subr.bf16.mxu0 %v1232_v5  ;;  %v1239_v12 = vld [vmem:[#allocation5 + $0x90] sm:$0xff]   ;;  %v1240_v13 = vld [vmem:[#allocation5 + $0x58] sm:$0xff]   ;;  %v1244_v17 = vld [vmem:[#allocation5 + $0x60] sm:$0xff]  }
  0x1a   :  { %1113 = vmatprep.subr.bf16.mxu1 %v1233_v6  ;;  %v1241_v14 = vld [vmem:[#allocation5 + $0xd8] sm:$0xff]   ;;  %v1245_v18 = vld [vmem:[#allocation5 + $0xe0] sm:$0xff]   ;;  %v1248_v21 = vld [vmem:[#allocation5 + $0x68] sm:$0xff]  }
  0x1b   :  { %v1242_v15 = vld [vmem:[#allocation5 + $0x18] sm:$0xff]   ;;  %v1246_v19 = vld [vmem:[#allocation5 + $0x20] sm:$0xff]   ;;  %v1249_v22 = vld [vmem:[#allocation5 + $0xe8] sm:$0xff]  }
  0x1c   :  { %1092 = vmatpush3.bf16.msra.mxu0 %v1234_v7  ;;  %v1243_v16 = vld [vmem:[#allocation5 + $0x98] sm:$0xff]   ;;  %v1247_v20 = vld [vmem:[#allocation5 + $0xa0] sm:$0xff]   ;;  %v1250_v23 = vld [vmem:[#allocation5 + $0x28] sm:$0xff]  }
  0x1d   :  { %1114 = vmatpush3.bf16.msra.mxu1 %v1235_v8  ;;  %1093 = vmatprep.subr.bf16.mxu0 %v1236_v9  ;;  %v1251_v24 = vld [vmem:[#allocation5 + $0xa8] sm:$0xff]   ;;  %v1252_v25 = vld [vmem:[#allocation5 + $0x70] sm:$0xff]   ;;  %v1256_v29 = vld [vmem:[#allocation5 + $0x78] sm:$0xff]  }
  0x1e   :  { %1115 = vmatprep.subr.bf16.mxu1 %v1237_v10  ;;  %v1253_v26 = vld [vmem:[#allocation5 + $0xf0] sm:$0xff]   ;;  %v1257_v30 = vld [vmem:[#allocation5 + $0xf8] sm:$0xff]   ;;  %v52_v33 = vld [vmem:[%s1520_s1 + $0x8] sm:$0xff] }
  0x1f   :  { %v1254_v27 = vld [vmem:[#allocation5 + $0x30] sm:$0xff]   ;;  %v1258_v31 = vld [vmem:[#allocation5 + $0x38] sm:$0xff]   ;;  %v60_v34 = vld [vmem:[%s1520_s1 + $0x48] sm:$0xff] }
  0x20   :  { %1094 = vmatpush3.bf16.msra.mxu0 %v1238_v11  ;;  %v1255_v28 = vld [vmem:[#allocation5 + $0xb0] sm:$0xff]   ;;  %v1259_v32 = vld [vmem:[#allocation5 + $0xb8] sm:$0xff]   ;;  %v68_v36 = vpack.c.bf16 %v60_v34, %v52_v33  ;;  %v1260_v45 = vld [vmem:[#allocation5 + $0x140] sm:$0xff]  }
  0x21   :  { %1116 = vmatpush3.bf16.msra.mxu1 %v1239_v12  ;;  %1095 = vmatprep.subr.bf16.mxu0 %v1240_v13  ;;  %v54_v35 = vld [vmem:[%s1520_s1 + $0x18] sm:$0xff]  ;;  %v51_v38 = vld [vmem:[%s1520_s1] sm:$0xff]  ;;  %v53_v42 = vld [vmem:[%s1520_s1 + $0x10] sm:$0xff] }
  0x22   :  { %1117 = vmatprep.subr.bf16.mxu1 %v1241_v14  ;;  %v62_v37 = vld [vmem:[%s1520_s1 + $0x58] sm:$0xff]  ;;  %v59_v39 = vld [vmem:[%s1520_s1 + $0x40] sm:$0xff]  ;;  %v61_v43 = vld [vmem:[%s1520_s1 + $0x50] sm:$0xff]  ;;  %626 = vmatprep.mubr.bf16.mxu0 %v68_v36 }
  0x23   :  { %v70_v40 = vpack.c.bf16 %v62_v37, %v54_v35  ;;  %v67_v41 = vpack.c.bf16 %v59_v39, %v51_v38  ;;  %v69_v44 = vpack.c.bf16 %v61_v43, %v53_v42  ;;  %v1261_v46 = vld [vmem:[#allocation5 + $0x1c0] sm:$0xff]   ;;  %v1264_v49 = vld [vmem:[#allocation5 + $0x148] sm:$0xff]   ;;  %v1268_v53 = vld [vmem:[#allocation5 + $0x150] sm:$0xff]  }
  0x24   :  { %1096 = vmatpush3.bf16.msra.mxu0 %v1242_v15  ;;  %v1262_v47 = vld [vmem:[#allocation5 + $0x100] sm:$0xff]   ;;  %v1265_v50 = vld [vmem:[#allocation5 + $0x1c8] sm:$0xff]   ;;  %v1269_v54 = vld [vmem:[#allocation5 + $0x1d0] sm:$0xff]  }
  0x25   :  { %1118 = vmatpush3.bf16.msra.mxu1 %v1243_v16  ;;  %1097 = vmatprep.subr.bf16.mxu0 %v1244_v17  ;;  %v1263_v48 = vld [vmem:[#allocation5 + $0x180] sm:$0xff]   ;;  %v1266_v51 = vld [vmem:[#allocation5 + $0x108] sm:$0xff]   ;;  %v1270_v55 = vld [vmem:[#allocation5 + $0x110] sm:$0xff]  }
  0x26   :  { %1119 = vmatprep.subr.bf16.mxu1 %v1245_v18  ;;  %667 = vmatprep.mubr.bf16.mxu1 %v70_v40  ;;  %v1267_v52 = vld [vmem:[#allocation5 + $0x188] sm:$0xff]   ;;  %v1271_v56 = vld [vmem:[#allocation5 + $0x190] sm:$0xff]   ;;  %v1272_v57 = vld [vmem:[#allocation5 + $0x158] sm:$0xff]  }
  0x27   :  { %v1273_v58 = vld [vmem:[#allocation5 + $0x1d8] sm:$0xff]   ;;  %v1276_v61 = vld [vmem:[#allocation5 + $0x160] sm:$0xff]   ;;  %v1280_v1 = vld [vmem:[#allocation5 + $0x168] sm:$0xff]  }
  0x28   :  { %1098 = vmatpush3.bf16.msra.mxu0 %v1246_v19  ;;  %v1274_v59 = vld [vmem:[#allocation5 + $0x118] sm:$0xff]   ;;  %v1277_v62 = vld [vmem:[#allocation5 + $0x1e0] sm:$0xff]   ;;  %v1281_v2 = vld [vmem:[#allocation5 + $0x1e8] sm:$0xff]  }
  0x29   :  { %1120 = vmatpush3.bf16.msra.mxu1 %v1247_v20  ;;  %1099 = vmatprep.subr.bf16.mxu0 %v1248_v21  ;;  %v1275_v60 = vld [vmem:[#allocation5 + $0x198] sm:$0xff]   ;;  %v1278_v63 = vld [vmem:[#allocation5 + $0x120] sm:$0xff]   ;;  %v1282_v3 = vld [vmem:[#allocation5 + $0x128] sm:$0xff]  }
  0x2a   :  { %1121 = vmatprep.subr.bf16.mxu1 %v1249_v22  ;;  %v1279_v0 = vld [vmem:[#allocation5 + $0x1a0] sm:$0xff]   ;;  %v1283_v4 = vld [vmem:[#allocation5 + $0x1a8] sm:$0xff]   ;;  %v1284_v5 = vld [vmem:[#allocation5 + $0x170] sm:$0xff]  }
  0x2b   :  { %v1285_v6 = vld [vmem:[#allocation5 + $0x1f0] sm:$0xff]   ;;  %v1288_v9 = vld [vmem:[#allocation5 + $0x178] sm:$0xff]   ;;  %v56_v13 = vld [vmem:[%s1520_s1 + $0x28] sm:$0xff] }
  0x2c   :  { %1100 = vmatpush3.bf16.msra.mxu0 %v1250_v23  ;;  %v1286_v7 = vld [vmem:[#allocation5 + $0x130] sm:$0xff]   ;;  %v1289_v10 = vld [vmem:[#allocation5 + $0x1f8] sm:$0xff]   ;;  %v64_v14 = vld [vmem:[%s1520_s1 + $0x68] sm:$0xff] }
  0x2d   :  { %1122 = vmatpush3.bf16.msra.mxu1 %v1251_v24  ;;  %1101 = vmatprep.subr.bf16.mxu0 %v1252_v25  ;;  %v1287_v8 = vld [vmem:[#allocation5 + $0x1b0] sm:$0xff]   ;;  %v1290_v11 = vld [vmem:[#allocation5 + $0x138] sm:$0xff]   ;;  %v72_v17 = vpack.c.bf16 %v64_v14, %v56_v13  ;;  %v1301_v35 = vld [vmem:[%s1525_s6 + $0x8] sm:$0xff]  }
  0x2e   :  { %1123 = vmatprep.subr.bf16.mxu1 %v1253_v26  ;;  %v1291_v12 = vld [vmem:[#allocation5 + $0x1b8] sm:$0xff]   ;;  %v57_v21 = vld [vmem:[%s1520_s1 + $0x30] sm:$0xff]  ;;  %v1331_v26 = vmov 0.0  }
  0x2f   :  { %v58_v15 = vld [vmem:[%s1520_s1 + $0x38] sm:$0xff]  ;;  %v55_v19 = vld [vmem:[%s1520_s1 + $0x20] sm:$0xff]  ;;  %v65_v23 = vld [vmem:[%s1520_s1 + $0x70] sm:$0xff] }
  0x30   :  { %1102 = vmatpush3.bf16.msra.mxu0 %v1254_v27  ;;  %v66_v16 = vld [vmem:[%s1520_s1 + $0x78] sm:$0xff]  ;;  %v63_v20 = vld [vmem:[%s1520_s1 + $0x60] sm:$0xff]  ;;  %v73_v24 = vpack.c.bf16 %v65_v23, %v57_v21  ;;  %v1293_v27 = vld [vmem:[%s1523_s4 + $0x8] sm:$0xff]  }
  0x31   :  { %1124 = vmatpush3.bf16.msra.mxu1 %v1255_v28  ;;  %1103 = vmatprep.subr.bf16.mxu0 %v1256_v29  ;;  %v74_v18 = vpack.c.bf16 %v66_v16, %v58_v15  ;;  %v71_v22 = vpack.c.bf16 %v63_v20, %v55_v19  ;;  %v1292_v25 = vld [vmem:[%s1523_s4] sm:$0xff]   ;;  %v1294_v28 = vld [vmem:[%s1523_s4 + $0x10] sm:$0xff]   ;;  %v1295_v29 = vld [vmem:[%s1523_s4 + $0x18] sm:$0xff]  }
  0x32   :  { %1125 = vmatprep.subr.bf16.mxu1 %v1257_v30  ;;  %v1296_v30 = vld [vmem:[%s1523_s4 + $0x20] sm:$0xff]   ;;  %v1299_v33 = vld [vmem:[%s1523_s4 + $0x38] sm:$0xff]  }
  0x33   :  { %v1300_v34 = vld [vmem:[%s1525_s6] sm:$0xff]  }
  0x34   :  { %1104 = vmatpush3.bf16.msra.mxu0 %v1258_v31  ;;  %v1297_v31 = vld [vmem:[%s1523_s4 + $0x28] sm:$0xff]   ;;  %v1007_v38 = vld [vmem:[%s1522_s3] ss:$0 sm:$0xff] }
  0x35   :  { %1126 = vmatpush3.bf16.msra.mxu1 %v1259_v32  ;;  %1133 = vmatprep.subr.bf16.mxu0 %v1260_v45  ;;  %v1298_v32 = vld [vmem:[%s1523_s4 + $0x30] sm:$0xff]  }
  0x36   :  { %1155 = vmatprep.subr.bf16.mxu1 %v1261_v46 }
  0x37   :  { %627 = vmatmul.mubr.bf16.vlgmr.msra.gmra.mrb[0].mxu0 %v67_v41 }
  0x38   :  { %668 = vmatmul.mubr.bf16.vlgmr.msra.gmra.mrb[0].mxu1 %v69_v44  ;;  %1134 = vmatpush3.bf16.msra.mxu0 %v1262_v47 }
  0x39   :  { %1156 = vmatpush3.bf16.msra.mxu1 %v1263_v48  ;;  %1135 = vmatprep.subr.bf16.mxu0 %v1264_v49 }
  0x3a   :  { %1157 = vmatprep.subr.bf16.mxu1 %v1265_v50  ;;  %708 = vmatprep.mubr.bf16.mxu0 %v72_v17 }
  0x3b   :  { %749 = vmatprep.mubr.bf16.mxu1 %v74_v18 }
  0x3c   :  { %1136 = vmatpush3.bf16.msra.mxu0 %v1266_v51 }
  0x3d   :  { %1158 = vmatpush3.bf16.msra.mxu1 %v1267_v52  ;;  %1137 = vmatprep.subr.bf16.mxu0 %v1268_v53 }
  0x3e   :  { %1159 = vmatprep.subr.bf16.mxu1 %v1269_v54 }
  0x40   :  { %1138 = vmatpush3.bf16.msra.mxu0 %v1270_v55 }
  0x41   :  { %1160 = vmatpush3.bf16.msra.mxu1 %v1271_v56  ;;  %1139 = vmatprep.subr.bf16.mxu0 %v1272_v57 }
  0x42   :  { %1161 = vmatprep.subr.bf16.mxu1 %v1273_v58 }
  0x44   :  { %1140 = vmatpush3.bf16.msra.mxu0 %v1274_v59 }
  0x45   :  { %1162 = vmatpush3.bf16.msra.mxu1 %v1275_v60  ;;  %1141 = vmatprep.subr.bf16.mxu0 %v1276_v61 }
  0x46   :  { %1163 = vmatprep.subr.bf16.mxu1 %v1277_v62 }
  0x48   :  { %1142 = vmatpush3.bf16.msra.mxu0 %v1278_v63 }
  0x49   :  { %1164 = vmatpush3.bf16.msra.mxu1 %v1279_v0  ;;  %1143 = vmatprep.subr.bf16.mxu0 %v1280_v1 }
  0x4a   :  { %1165 = vmatprep.subr.bf16.mxu1 %v1281_v2 }
  0x4c   :  { %1144 = vmatpush3.bf16.msra.mxu0 %v1282_v3 }
  0x4d   :  { %1166 = vmatpush3.bf16.msra.mxu1 %v1283_v4  ;;  %1145 = vmatprep.subr.bf16.mxu0 %v1284_v5 }
  0x4e   :  { %1167 = vmatprep.subr.bf16.mxu1 %v1285_v6 }
  0x50   :  { %1146 = vmatpush3.bf16.msra.mxu0 %v1286_v7 }
  0x51   :  { %1168 = vmatpush3.bf16.msra.mxu1 %v1287_v8  ;;  %1147 = vmatprep.subr.bf16.mxu0 %v1288_v9 }
  0x52   :  { %1169 = vmatprep.subr.bf16.mxu1 %v1289_v10  ;;  %v1302_v10 = vld [vmem:[%s1525_s6 + $0x10] sm:$0xff]  }
  0x54   :  { %1148 = vmatpush3.bf16.msra.mxu0 %v1290_v11  ;;  %v1303_v11 = vld [vmem:[%s1525_s6 + $0x18] sm:$0xff]  }
  0x55   :  { %1170 = vmatpush3.bf16.msra.mxu1 %v1291_v12  ;;  %1191 = vmatprep.subr.bf16.mxu0 %v1331_v26  ;;  %v1072_v12 = vld [vmem:[%s1524_s5] ss:$0 sm:$0xff] }
  0x56   :  { %1211 = vmatprep.subr.bf16.mxu1 %v1331_v26 }
  0x57   :  { %709 = vmatmul.mubr.bf16.vlgmr.msra.gmra.mrb[4].mxu0 %v71_v22 }
  0x58   :  { %750 = vmatmul.mubr.bf16.vlgmr.msra.gmra.mrb[4].mxu1 %v73_v24  ;;  %1192 = vmatpush3.bf16.msra.mxu0 %v1292_v25  ;;  %v1081_v24 = vld [vmem:[%s1526_s7] ss:$0 sm:$0xff] }
  0x59   :  { %1193 = vmatprep.subr.bf16.mxu0 %v1331_v26  ;;  %1207 = vmatprep.mubr.msk.bf16.mxu0 %vm1332_vm0, %v1331_v26 }
  0x5a   :  { %1219 = vmatprep.mubr.msk.bf16.mxu1 %vm1332_vm0, %v1331_v26  ;;  %1212 = vmatpush3.bf16.msra.mxu1 %v1300_v34 }
  0x5b   :  { %1213 = vmatprep.subr.bf16.mxu1 %v1331_v26 }
  0x5c   :  { %1194 = vmatpush3.bf16.msra.mxu0 %v1293_v27 }
  0x5d   :  { %1195 = vmatprep.subr.bf16.mxu0 %v1331_v26 }
  0x5e   :  { %1214 = vmatpush3.bf16.msra.mxu1 %v1301_v35 }
  0x5f   :  { %1215 = vmatprep.subr.bf16.mxu1 %v1331_v26 }
  0x60   :  { %1196 = vmatpush3.bf16.msra.mxu0 %v1294_v28 }
  0x61   :  { %1197 = vmatprep.subr.bf16.mxu0 %v1331_v26 }
  0x62   :  { %1216 = vmatpush3.bf16.msra.mxu1 %v1302_v10 }
  0x63   :  { %1217 = vmatprep.subr.bf16.mxu1 %v1331_v26 }
  0x64   :  { %1198 = vmatpush3.bf16.msra.mxu0 %v1295_v29 }
  0x65   :  { %1199 = vmatprep.subr.bf16.mxu0 %v1331_v26 }
  0x66   :  { %1218 = vmatpush3.bf16.msra.mxu1 %v1303_v11 }
  0x68   :  { %1200 = vmatpush3.bf16.msra.mxu0 %v1296_v30 }
  0x69   :  { %1201 = vmatprep.subr.bf16.mxu0 %v1331_v26 }
  0x6c   :  { %1202 = vmatpush3.bf16.msra.mxu0 %v1297_v31 }
  0x6d   :  { %1203 = vmatprep.subr.bf16.mxu0 %v1331_v26 }
  0x70   :  { %1204 = vmatpush3.bf16.msra.mxu0 %v1298_v32  ;;  %v1087_v32 = vld [vmem:[%s1527_s8] ss:$0 sm:$0xff] }
  0x71   :  { %1205 = vmatprep.subr.bf16.mxu0 %v1331_v26 }
  0x74   :  { %1206 = vmatpush3.bf16.msra.mxu0 %v1299_v33 }
 0x10a   :  { %v1105_v36 = vpop.f32.mrb[0].mxu0 }
 0x10b   :  { %v1127_v37 = vpop.f32.mrb[0].mxu1  ;;  %v1106_v39 = vpop.f32.mrb[1].mxu0 }
 0x10c   :  { %v1107_v40 = vadd.f32 %v1106_v39, %v1105_v36  ;;  %v1128_v41 = vpop.f32.mrb[1].mxu1  ;;  %v1108_v42 = vpop.f32.mrb[2].mxu0 }
 0x10d   :  { %v1129_v43 = vadd.f32 %v1128_v41, %v1127_v37  ;;  %v1130_v44 = vpop.f32.mrb[2].mxu1  ;;  %v1109_v45 = vpop.f32.mrb[3].mxu0 }
 0x10e   :  { %v629_v46 = vadd.f32 %v1107_v40, %v1007_v38  ;;  %v1110_v47 = vadd.f32 %v1109_v45, %v1108_v42  ;;  %v1131_v48 = vpop.f32.mrb[3].mxu1  ;;  %v1088_v40 = vld [vmem:[#allocation4] ss:$0 sm:$0xff] }
 0x10f   :  { %v1132_v49 = vadd.f32 %v1131_v48, %v1130_v44 }
 0x110   :  { %v670_v50 = vadd.f32 %v1129_v43, %v629_v46  ;;  %v632_v51 = vadd.f32 %v1110_v47, %v1007_v38 }
 0x112   :  { %v673_v52 = vadd.f32 %v1132_v49, %v632_v51 }
 0x12a   :  { %v1149_v53 = vpop.f32.mrb[4].mxu0 }
 0x12b   :  { %v1171_v54 = vpop.f32.mrb[4].mxu1  ;;  %v1150_v55 = vpop.f32.mrb[5].mxu0 }
 0x12c   :  { %v1151_v56 = vadd.f32 %v1150_v55, %v1149_v53  ;;  %v1172_v57 = vpop.f32.mrb[5].mxu1  ;;  %v1152_v58 = vpop.f32.mrb[6].mxu0 }
 0x12d   :  { %v1173_v59 = vadd.f32 %v1172_v57, %v1171_v54  ;;  %v1174_v60 = vpop.f32.mrb[6].mxu1  ;;  %v1153_v61 = vpop.f32.mrb[7].mxu0 }
 0x12e   :  { %v711_v62 = vadd.f32 %v1151_v56, %v670_v50  ;;  %v1154_v63 = vadd.f32 %v1153_v61, %v1152_v58  ;;  %v1175_v0 = vpop.f32.mrb[7].mxu1 }
 0x12f   :  { %v1176_v1 = vadd.f32 %v1175_v0, %v1174_v60 }
 0x130   :  { %v752_v2 = vadd.f32 %v1173_v59, %v711_v62  ;;  %v714_v3 = vadd.f32 %v1154_v63, %v673_v52 }
 0x132   :  { %v760_v4 = vmul.f32 0.2, %v752_v2  ;;  %v755_v5 = vadd.f32 %v1176_v1, %v714_v3  ;;  %vm758_vm1 = vcmp.ge.f32.partialorder %v752_v2, 0.0 }
 0x134   :  { %vm759_vm2 = vcmp.ge.f32.partialorder %v755_v5, 0.0  ;;  %v761_v6 = vmul.f32 0.2, %v755_v5  ;;  %v762_v7 = vsel %vm758_vm1, %v752_v2, %v760_v4 }
 0x136   :  { %v763_v8 = vsel %vm759_vm2, %v755_v5, %v761_v6 }
 0x137   :  { %v764_v9 = vpack.c.bf16 %v763_v8, %v762_v7 }
 0x139   :  { %1208 = vmatmul.mubr.bf16.vlgmr.msra.gmra.mrb[8].mxu0 %v764_v9 }
 0x20c   :  { %v870_v13 = vpop.f32.mrb[8].mxu0 }
 0x20d   :  { %v871_v14 = vadd.f32 %v1072_v12, %v870_v13  ;;  %v1209_v15 = vpop.f32.mrb[9].mxu0 }
 0x20e   :  { %v873_v16 = vpop.f32.mrb[10].mxu0 }
 0x20f   :  { %v879_v17 = vmul.f32 0.2, %v871_v14  ;;  %v874_v18 = vadd.f32 %v1072_v12, %v873_v16  ;;  %v1210_v19 = vpop.f32.mrb[11].mxu0  ;;  %vm877_vm3 = vcmp.ge.f32.partialorder %v871_v14, 0.0 }
 0x211   :  { %vm878_vm4 = vcmp.ge.f32.partialorder %v874_v18, 0.0  ;;  %v880_v20 = vmul.f32 0.2, %v874_v18  ;;  %v881_v21 = vsel %vm877_vm3, %v871_v14, %v879_v17 }
 0x213   :  { %v882_v22 = vsel %vm878_vm4, %v874_v18, %v880_v20 }
 0x214   :  { %v883_v23 = vpack.c.bf16 %v882_v22, %v881_v21 }
 0x216   :  { %1220 = vmatmul.mubr.msk.bf16.vlgmr.msra.gmra.mrb[8].mxu1 %vm923_vm5, %v883_v23 }
 0x2e9   :  { %v961_v25 = vpop.f32.mrb[8].mxu1 }
 0x2ea   :  { %v962_v26 = vadd.f32 %v1081_v24, %v961_v25  ;;  %v1221_v27 = vpop.f32.mrb[9].mxu1 }
 0x2eb   :  { %v964_v28 = vpop.f32.mrb[10].mxu1 }
 0x2ec   :  { %v970_v29 = vmul.f32 0.2, %v962_v26  ;;  %v965_v30 = vadd.f32 %v1081_v24, %v964_v28  ;;  %v1222_v31 = vpop.f32.mrb[11].mxu1  ;;  %vm968_vm6 = vcmp.ge.f32.partialorder %v962_v26, 0.0 }
 0x2ee   :  { %vm969_vm7 = vcmp.ge.f32.partialorder %v965_v30, 0.0  ;;  %v971_v33 = vmul.f32 0.2, %v965_v30  ;;  %v972_v34 = vsel %vm968_vm6, %v962_v26, %v970_v29 }
 0x2ef   :  { %v981_v35 = vmul.f32 %v1087_v32, %v972_v34 }
 0x2f0   :  { %v973_v36 = vsel %vm969_vm7, %v965_v30, %v971_v33 }
 0x2f1   :  { %v984_v37 = vsel %vm983_vm8, %v981_v35, 0.0  ;;  %v982_v38 = vmul.f32 %v1087_v32, %v973_v36 }
 0x2f2   :  { %985 = vadd.xlane.f32.xlu0 %v984_v37 }
 0x2f3   :  { %v987_v39 = vsel %vm983_vm8, %v982_v38, 0.0 }
 0x2f6   :  { %988 = vadd.xlane.f32.xlu0 %v987_v39 }
 0x37f   :  { %v986_v41 = vpop.xlane.xlu0 %985 }
 0x380   :  { %v997_v42 = vadd.f32 %v1088_v40, %v986_v41 }
 0x382   :  { %1000 = vst.msk [vmem:[%s1529_s10] sm:$0xff] %vm999_vm9, %v997_v42 }
 0x383   :  { %v989_v43 = vpop.xlane.xlu0 %988 }
 0x384   :  { %v998_v44 = vadd.f32 %v1088_v40, %v989_v43 }
 0x386   :  { %1001 = vst.msk [vmem:[%s1529_s10 + $0x8] sm:$0xff] %vm999_vm9, %v998_v44 }
 0x387   :  { %1006 = vsyncpa [#allocation6], 1 }

</bundles_post_ra>
